<compile_context>
chip_gen: v7x
topology: tpu7x:2x2x1
jax: 0.10.0
libtpu: 0.0.40
codegen_flags: <defaults>
</compile_context>

<pallas_src>
import math

import jax
import jax.numpy as jnp
from jax.experimental import pallas as pl
from jax.experimental.pallas import tpu as pltpu

# ----------------------------- model sizes (small) ---------------------------
VOCAB = 100
VOCAB_PAD = 128   # padded vocab rows for the one-hot gather matmul
H = 32            # num_hiddens = key/query/value size
NH = 4            # num_heads
HD = H // NH      # head dim
FFN_H = 64        # ffn_num_hiddens
MAX_LEN = 64
B = 2             # batch
S = 8             # sequence length
BS = B * S        # folded row count
LN_EPS = 1e-5     # PyTorch LayerNorm default
LANES = 128       # all packed slabs are full-lane

# ---- packed weight-slab row layout (W_ROWS, 128) ----
WQKV_ROW = 0                    # rows [0, H)           : [Wq|Wk|Wv] in lanes 0:3H
WO_ROW = H                      # rows [H, 2H)          : Wo in lanes 0:H
W1_ROW = 2 * H                  # rows [2H, 3H)         : W1 in lanes 0:FFN_H
W2_ROW = 3 * H                  # rows [3H, 3H+FFN_H)   : W2 in lanes 0:H
TOK_ROW = 3 * H + FFN_H         # rows [160, 160+128)   : token table in lanes 0:H
W_ROWS = TOK_ROW + VOCAB_PAD    # 288

# ---- packed bias / LN / embedding-const slab row layout (VEC_ROWS, 128) ----
BQKV_ROW, BO_ROW, G1_ROW, BE1_ROW, BF1_ROW, BF2_ROW, G2_ROW, BE2_ROW = range(8)
POS_ROW = 8                     # rows [8, 8+BS)  : positional rows pre-tiled to (BS, H)
SEG_ROW = POS_ROW + BS          # rows [24, 26)   : segment table (2, H)
VEC_ROWS = 32


def _layer_norm(x, gamma, beta):
    # x: (BS, H); gamma/beta: (1, H)
    mean = jnp.mean(x, axis=-1, keepdims=True)
    var = jnp.mean((x - mean) * (x - mean), axis=-1, keepdims=True)
    return (x - mean) * jax.lax.rsqrt(var + LN_EPS) * gamma + beta


def encoder_kernel(valid_lens_ref,          # scalar-prefetch, SMEM (B,)
                   tok_ref,                 # (BS, 1) int32 token ids
                   seg_ref,                 # (BS, 1) int32 segment ids
                   w_ref,                   # (W_ROWS, 128) packed weights + token table
                   vec_ref,                 # (VEC_ROWS, 128) biases / LN / pos / seg
                   out_ref):                # (BS, H)
    f32 = jnp.float32

    # --- embeddings: one-hot token gather on the MXU, in-kernel ---------------
    tok = tok_ref[...]                                                   # (BS, 1) int32
    vocab_col = jax.lax.broadcasted_iota(jnp.int32, (BS, VOCAB_PAD), 1)
    onehot = (vocab_col == tok).astype(f32)                              # (BS, VOCAB_PAD)
    tok_tbl = w_ref[TOK_ROW:TOK_ROW + VOCAB_PAD, 0:H]                    # (VOCAB_PAD, H)
    x = jnp.dot(onehot, tok_tbl, preferred_element_type=f32)             # (BS, H)

    seg = seg_ref[...].astype(f32)                                       # (BS, 1)
    seg0 = vec_ref[SEG_ROW:SEG_ROW + 1, 0:H]                             # (1, H)
    seg1 = vec_ref[SEG_ROW + 1:SEG_ROW + 2, 0:H]
    x = x + seg0 + seg * (seg1 - seg0)            # segment embedding (2-row select)
    x = x + vec_ref[POS_ROW:POS_ROW + BS, 0:H]    # positional rows, pre-tiled

    # --- fused QKV projection --------------------------------------------------
    wqkv = w_ref[WQKV_ROW:WQKV_ROW + H, 0:3 * H]                         # (H, 3H)
    bqkv = vec_ref[BQKV_ROW:BQKV_ROW + 1, 0:3 * H]                       # (1, 3H)
    qkv = jnp.dot(x, wqkv, preferred_element_type=f32) + bqkv            # (BS, 3H)
    q = qkv[:, 0:H]
    k = qkv[:, H:2 * H]
    v = qkv[:, 2 * H:3 * H]

    # --- additive attention-mask bias, built ONCE from SMEM valid_lens --------
    r_idx = jax.lax.broadcasted_iota(jnp.int32, (BS, BS), 0)
    c_idx = jax.lax.broadcasted_iota(jnp.int32, (BS, BS), 1)
    keep = jnp.zeros((BS, BS), jnp.bool_)
    for b in range(B):                               # static, B is tiny
        vl_b = valid_lens_ref[b]                     # scalar int32 from SMEM
        row_in_b = (r_idx >= b * S) & (r_idx < (b + 1) * S)
        col_ok = (c_idx >= b * S) & (c_idx < b * S + vl_b)
        keep = keep | (row_in_b & col_ok)
    mask_bias = jnp.where(keep, f32(0.0), f32(-1e6))                     # (BS, BS)
    mask_bias_all = jnp.concatenate([mask_bias] * NH, axis=0)            # (NH*BS, BS)

    # --- stacked-head attention: ONE QK matmul + ONE softmax pass -------------
    lane = jax.lax.broadcasted_iota(jnp.int32, (1, H), 1)
    head_masks = [(lane >= h * HD) & (lane < (h + 1) * HD) for h in range(NH)]
    q_stacked = jnp.concatenate([jnp.where(m, q, 0.0) for m in head_masks],
                                axis=0)                                  # (NH*BS, H)

    inv_sqrt_d = f32(1.0 / math.sqrt(HD))
    # contract last dims (q_stacked . k^T) without materializing a transpose
    s_all = jax.lax.dot_general(q_stacked, k, (((1,), (1,)), ((), ())),
                                preferred_element_type=f32)              # (NH*BS, BS)
    s_all = s_all * inv_sqrt_d + mask_bias_all
    s_all = s_all - jnp.max(s_all, axis=-1, keepdims=True)
    p_all = jnp.exp(s_all)
    p_all = p_all * pl.reciprocal(jnp.sum(p_all, axis=-1, keepdims=True),
                                  approx=True)

    # PV: NH tiny sublane-slice matmuls; each head lands in its own lane range.
    attn = jnp.zeros((BS, H), f32)
    for h in range(NH):
        v_h = jnp.where(head_masks[h], v, 0.0)
        attn = attn + jnp.dot(p_all[h * BS:(h + 1) * BS, :], v_h,
                              preferred_element_type=f32)

    wo = w_ref[WO_ROW:WO_ROW + H, 0:H]
    bo = vec_ref[BO_ROW:BO_ROW + 1, 0:H]
    attn = jnp.dot(attn, wo, preferred_element_type=f32) + bo

    # --- AddNorm 1 -------------------------------------------------------------
    y = _layer_norm(x + attn,
                    vec_ref[G1_ROW:G1_ROW + 1, 0:H],
                    vec_ref[BE1_ROW:BE1_ROW + 1, 0:H])

    # --- PositionWiseFFN -------------------------------------------------------
    w1 = w_ref[W1_ROW:W1_ROW + H, 0:FFN_H]
    bf1 = vec_ref[BF1_ROW:BF1_ROW + 1, 0:FFN_H]
    w2 = w_ref[W2_ROW:W2_ROW + FFN_H, 0:H]
    bf2 = vec_ref[BF2_ROW:BF2_ROW + 1, 0:H]
    hdn = jnp.maximum(jnp.dot(y, w1, preferred_element_type=f32) + bf1, 0.0)
    ffn = jnp.dot(hdn, w2, preferred_element_type=f32) + bf2

    # --- AddNorm 2 -------------------------------------------------------------
    out_ref[...] = _layer_norm(y + ffn,
                               vec_ref[G2_ROW:G2_ROW + 1, 0:H],
                               vec_ref[BE2_ROW:BE2_ROW + 1, 0:H])


def pack_params(p):
    """One-time packing of all parameters into two full-lane slabs (NOT per-call)."""
    w_slab = jnp.zeros((W_ROWS, LANES), jnp.float32)
    wqkv = jnp.concatenate([p["wq"], p["wk"], p["wv"]], axis=1)          # (H, 3H)
    w_slab = w_slab.at[WQKV_ROW:WQKV_ROW + H, 0:3 * H].set(wqkv)
    w_slab = w_slab.at[WO_ROW:WO_ROW + H, 0:H].set(p["wo"])
    w_slab = w_slab.at[W1_ROW:W1_ROW + H, 0:FFN_H].set(p["w1"])
    w_slab = w_slab.at[W2_ROW:W2_ROW + FFN_H, 0:H].set(p["w2"])
    w_slab = w_slab.at[TOK_ROW:TOK_ROW + VOCAB, 0:H].set(p["tok_table"])

    vec_slab = jnp.zeros((VEC_ROWS, LANES), jnp.float32)
    bqkv = jnp.concatenate([p["bq"], p["bk"], p["bv"]], axis=1)          # (1, 3H)
    vec_slab = vec_slab.at[BQKV_ROW:BQKV_ROW + 1, 0:3 * H].set(bqkv)
    vec_slab = vec_slab.at[BO_ROW, 0:H].set(p["bo"][0])
    vec_slab = vec_slab.at[G1_ROW, 0:H].set(p["g1"][0])
    vec_slab = vec_slab.at[BE1_ROW, 0:H].set(p["be1"][0])
    vec_slab = vec_slab.at[BF1_ROW, 0:FFN_H].set(p["bf1"][0])
    vec_slab = vec_slab.at[BF2_ROW, 0:H].set(p["bf2"][0])
    vec_slab = vec_slab.at[G2_ROW, 0:H].set(p["g2"][0])
    vec_slab = vec_slab.at[BE2_ROW, 0:H].set(p["be2"][0])
    pos_tiled = jnp.tile(p["pos"][0, :S, :], (B, 1))                     # (BS, H)
    vec_slab = vec_slab.at[POS_ROW:POS_ROW + BS, 0:H].set(pos_tiled)
    vec_slab = vec_slab.at[SEG_ROW:SEG_ROW + 2, 0:H].set(p["seg_table"])
    return {"w_slab": w_slab, "vec_slab": vec_slab}


@jax.jit
def bert_encoder_forward(tokens, segments, valid_lens, packed):
    Bsz, Slen = tokens.shape
    rows = Bsz * Slen

    # Per-call prep is just metadata reshapes; everything else is pre-packed.
    tok_ids = tokens.reshape(rows, 1).astype(jnp.int32)
    seg_ids = segments.reshape(rows, 1).astype(jnp.int32)

    grid_spec = pltpu.PrefetchScalarGridSpec(
        num_scalar_prefetch=1,
        grid=(1,),                                   # single invocation, whole batch
        in_specs=[
            pl.BlockSpec((rows, 1), lambda i, vl: (0, 0)),
            pl.BlockSpec((rows, 1), lambda i, vl: (0, 0)),
            pl.BlockSpec((W_ROWS, LANES), lambda i, vl: (0, 0)),
            pl.BlockSpec((VEC_ROWS, LANES), lambda i, vl: (0, 0)),
        ],
        out_specs=pl.BlockSpec((rows, H), lambda i, vl: (0, 0)),
    )

    fn = pl.pallas_call(
        encoder_kernel,
        out_shape=jax.ShapeDtypeStruct((rows, H), jnp.float32),
        grid_spec=grid_spec,
        compiler_params=pltpu.CompilerParams(
            dimension_semantics=("arbitrary",)),
    )
    out = fn(valid_lens.astype(jnp.int32), tok_ids, seg_ids,
             packed["w_slab"], packed["vec_slab"])
    return out.reshape(Bsz, Slen, H)


# ------------------------- pure-JAX reference (checking) ---------------------
def reference_forward(tokens, segments, valid_lens, p):
    x = p["tok_table"][tokens] + p["seg_table"][segments] + p["pos"][:, :S, :]
    q = x @ p["wq"] + p["bq"]
    k = x @ p["wk"] + p["bk"]
    v = x @ p["wv"] + p["bv"]

    def split(t):  # (B,S,H) -> (B,NH,S,HD)
        return t.reshape(B, S, NH, HD).transpose(0, 2, 1, 3)

    qs, ks, vs = split(q), split(k), split(v)
    scores = jnp.einsum("bnqd,bnkd->bnqk", qs, ks) / math.sqrt(HD)
    col = jnp.arange(S)[None, None, None, :]
    keep = col < valid_lens[:, None, None, None]
    scores = jnp.where(keep, scores, -1e6)
    attn_w = jax.nn.softmax(scores, axis=-1)
    o = jnp.einsum("bnqk,bnkd->bnqd", attn_w, vs).transpose(0, 2, 1, 3).reshape(B, S, H)
    o = o @ p["wo"] + p["bo"]

    def ln(t, g, be):
        m = t.mean(-1, keepdims=True)
        var = ((t - m) ** 2).mean(-1, keepdims=True)
        return (t - m) / jnp.sqrt(var + LN_EPS) * g + be

    y = ln(x + o, p["g1"], p["be1"])
    ffn = jnp.maximum(y @ p["w1"] + p["bf1"], 0.0) @ p["w2"] + p["bf2"]
    return ln(y + ffn, p["g2"], p["be2"])


def init_params(key):
    ks = jax.random.split(key, 16)
    n = lambda k, shp, s=0.02: (jax.random.normal(k, shp, jnp.float32) * s)
    return {
        "tok_table": n(ks[0], (VOCAB, H), 1.0),
        "seg_table": n(ks[1], (2, H), 1.0),
        "pos":       n(ks[2], (1, MAX_LEN, H), 1.0),
        "wq": n(ks[3], (H, H)),  "bq": jnp.zeros((1, H), jnp.float32),
        "wk": n(ks[4], (H, H)),  "bk": jnp.zeros((1, H), jnp.float32),
        "wv": n(ks[5], (H, H)),  "bv": jnp.zeros((1, H), jnp.float32),
        "wo": n(ks[6], (H, H)),  "bo": jnp.zeros((1, H), jnp.float32),
        "g1": jnp.ones((1, H), jnp.float32), "be1": jnp.zeros((1, H), jnp.float32),
        "w1": n(ks[7], (H, FFN_H)), "bf1": jnp.zeros((1, FFN_H), jnp.float32),
        "w2": n(ks[8], (FFN_H, H)), "bf2": jnp.zeros((1, H), jnp.float32),
        "g2": jnp.ones((1, H), jnp.float32), "be2": jnp.zeros((1, H), jnp.float32),
    }


if __name__ == "__main__":
    key = jax.random.PRNGKey(0)
    pkey, tkey, skey = jax.random.split(key, 3)
    params = init_params(pkey)
    packed = pack_params(params)                     # one-time packing (hoisted)
    packed = jax.tree_util.tree_map(jax.block_until_ready, packed)

    tokens = jax.random.randint(tkey, (B, S), 0, VOCAB, dtype=jnp.int32)
    segments = jax.random.randint(skey, (B, S), 0, 2, dtype=jnp.int32)
    valid_lens = jnp.array([5, 8], dtype=jnp.int32)   # per-batch valid key length

    out = bert_encoder_forward(tokens, segments, valid_lens, packed)
    out = jax.block_until_ready(out)

    ref = reference_forward(tokens, segments, valid_lens, params)
    assert out.shape == (B, S, H)
    # Tolerance 1e-3: approx reciprocal (EUP) in the softmax introduces a small
    # relative error vs exact division in the reference.
    assert jnp.allclose(out, ref, rtol=1e-3, atol=1e-3), "mismatch vs pure-JAX reference"

    print("KERNEL_OK")
</pallas_src>

<mosaic_0001>
module attributes {stable_mosaic.version = 11 : i64} {
  func.func @encoder_kernel(%arg0: i32, %arg1: memref<2xi32, #tpu.memory_space<smem>>, %arg2: memref<16x1xi32, #tpu.memory_space<vmem>>, %arg3: memref<16x1xi32, #tpu.memory_space<vmem>>, %arg4: memref<288x128xf32, #tpu.memory_space<vmem>>, %arg5: memref<32x128xf32, #tpu.memory_space<vmem>>, %arg6: memref<16x32xf32, #tpu.memory_space<vmem>>) attributes {dimension_semantics = [#tpu.dimension_semantics<arbitrary>], iteration_bounds = array<i64: 1>, scalar_prefetch = 1 : i64, scratch_operands = 0 : i64, tpu.core_type = #tpu.core_type<tc>, window_params = [{pipeline_mode = #tpu.pipeline_mode<synchronous>, transform_indices = @transform_0, window_bounds = array<i64: 16, 1>}, {pipeline_mode = #tpu.pipeline_mode<synchronous>, transform_indices = @transform_1, window_bounds = array<i64: 16, 1>}, {pipeline_mode = #tpu.pipeline_mode<synchronous>, transform_indices = @transform_2, window_bounds = array<i64: 288, 128>}, {pipeline_mode = #tpu.pipeline_mode<synchronous>, transform_indices = @transform_3, window_bounds = array<i64: 32, 128>}, {pipeline_mode = #tpu.pipeline_mode<synchronous>, transform_indices = @transform_4, window_bounds = array<i64: 16, 32>}]} {
    %c0 = arith.constant 0 : index
    %c0_0 = arith.constant 0 : index
    %0 = vector.load %arg2[%c0, %c0_0] : memref<16x1xi32, #tpu.memory_space<vmem>>, vector<16x1xi32>
    %1 = tpu.iota {dimensions = array<i32: 1>} : vector<16x128xi32>
    %2 = vector.broadcast %0 : vector<16x1xi32> to vector<16x128xi32>
    %3 = arith.cmpi eq, %1, %2 : vector<16x128xi32>
    %4 = arith.extui %3 : vector<16x128xi1> to vector<16x128xi32>
    %5 = arith.sitofp %4 : vector<16x128xi32> to vector<16x128xf32>
    %c160 = arith.constant 160 : index
    %c0_1 = arith.constant 0 : index
    %6 = vector.load %arg4[%c160, %c0_1] : memref<288x128xf32, #tpu.memory_space<vmem>>, vector<128x32xf32>
    %cst = arith.constant dense<0.000000e+00> : vector<16x32xf32>
    %7 = tpu.matmul %5, %6, %cst {dimension_numbers = #tpu.dot_dimension_numbers<[1], [0], [0], [1], [0, 0, 1, 1], [], []>} : vector<16x128xf32>, vector<128x32xf32>, vector<16x32xf32> -> vector<16x32xf32>
    %c0_2 = arith.constant 0 : index
    %c0_3 = arith.constant 0 : index
    %8 = vector.load %arg3[%c0_2, %c0_3] : memref<16x1xi32, #tpu.memory_space<vmem>>, vector<16x1xi32>
    %9 = arith.sitofp %8 : vector<16x1xi32> to vector<16x1xf32>
    %c24 = arith.constant 24 : index
    %c0_4 = arith.constant 0 : index
    %10 = vector.load %arg5[%c24, %c0_4] : memref<32x128xf32, #tpu.memory_space<vmem>>, vector<1x32xf32>
    %c25 = arith.constant 25 : index
    %c0_5 = arith.constant 0 : index
    %11 = vector.load %arg5[%c25, %c0_5] : memref<32x128xf32, #tpu.memory_space<vmem>>, vector<1x32xf32>
    %12 = vector.broadcast %10 : vector<1x32xf32> to vector<16x32xf32>
    %13 = arith.addf %7, %12 : vector<16x32xf32>
    %14 = arith.subf %11, %10 : vector<1x32xf32>
    %15 = vector.broadcast %9 : vector<16x1xf32> to vector<16x32xf32>
    %16 = vector.broadcast %14 : vector<1x32xf32> to vector<16x32xf32>
    %17 = arith.mulf %15, %16 : vector<16x32xf32>
    %18 = arith.addf %13, %17 : vector<16x32xf32>
    %c8 = arith.constant 8 : index
    %c0_6 = arith.constant 0 : index
    %19 = vector.load %arg5[%c8, %c0_6] : memref<32x128xf32, #tpu.memory_space<vmem>>, vector<16x32xf32>
    %20 = arith.addf %18, %19 : vector<16x32xf32>
    %c0_7 = arith.constant 0 : index
    %c0_8 = arith.constant 0 : index
    %21 = vector.load %arg4[%c0_7, %c0_8] : memref<288x128xf32, #tpu.memory_space<vmem>>, vector<32x96xf32>
    %c0_9 = arith.constant 0 : index
    %c0_10 = arith.constant 0 : index
    %22 = vector.load %arg5[%c0_9, %c0_10] : memref<32x128xf32, #tpu.memory_space<vmem>>, vector<1x96xf32>
    %cst_11 = arith.constant dense<0.000000e+00> : vector<16x96xf32>
    %23 = tpu.matmul %20, %21, %cst_11 {dimension_numbers = #tpu.dot_dimension_numbers<[1], [0], [0], [1], [0, 0, 1, 1], [], []>} : vector<16x32xf32>, vector<32x96xf32>, vector<16x96xf32> -> vector<16x96xf32>
    %24 = vector.broadcast %22 : vector<1x96xf32> to vector<16x96xf32>
    %25 = arith.addf %23, %24 : vector<16x96xf32>
    %26 = vector.extract_strided_slice %25 {offsets = [0, 0], sizes = [16, 32], strides = [1, 1]} : vector<16x96xf32> to vector<16x32xf32>
    %27 = vector.extract_strided_slice %25 {offsets = [0, 32], sizes = [16, 32], strides = [1, 1]} : vector<16x96xf32> to vector<16x32xf32>
    %28 = vector.extract_strided_slice %25 {offsets = [0, 64], sizes = [16, 32], strides = [1, 1]} : vector<16x96xf32> to vector<16x32xf32>
    %29 = tpu.iota {dimensions = array<i32: 0>} : vector<16x16xi32>
    %30 = tpu.iota {dimensions = array<i32: 1>} : vector<16x16xi32>
    %false = arith.constant false
    %31 = vector.broadcast %false : i1 to vector<16x16xi1>
    %c0_12 = arith.constant 0 : index
    %32 = memref.load %arg1[%c0_12] : memref<2xi32, #tpu.memory_space<smem>>
    %c0_i32 = arith.constant 0 : i32
    %33 = vector.broadcast %c0_i32 : i32 to vector<16x16xi32>
    %34 = arith.cmpi sge, %29, %33 : vector<16x16xi32>
    %c8_i32 = arith.constant 8 : i32
    %35 = vector.broadcast %c8_i32 : i32 to vector<16x16xi32>
    %36 = arith.cmpi slt, %29, %35 : vector<16x16xi32>
    %37 = arith.andi %34, %36 : vector<16x16xi1>
    %c0_i32_13 = arith.constant 0 : i32
    %38 = vector.broadcast %c0_i32_13 : i32 to vector<16x16xi32>
    %39 = arith.cmpi sge, %30, %38 : vector<16x16xi32>
    %c0_i32_14 = arith.constant 0 : i32
    %40 = arith.addi %c0_i32_14, %32 : i32
    %41 = vector.broadcast %40 : i32 to vector<16x16xi32>
    %42 = arith.cmpi slt, %30, %41 : vector<16x16xi32>
    %43 = arith.andi %39, %42 : vector<16x16xi1>
    %44 = arith.andi %37, %43 : vector<16x16xi1>
    %45 = arith.ori %31, %44 : vector<16x16xi1>
    %c1 = arith.constant 1 : index
    %46 = memref.load %arg1[%c1] : memref<2xi32, #tpu.memory_space<smem>>
    %c8_i32_15 = arith.constant 8 : i32
    %47 = vector.broadcast %c8_i32_15 : i32 to vector<16x16xi32>
    %48 = arith.cmpi sge, %29, %47 : vector<16x16xi32>
    %c16_i32 = arith.constant 16 : i32
    %49 = vector.broadcast %c16_i32 : i32 to vector<16x16xi32>
    %50 = arith.cmpi slt, %29, %49 : vector<16x16xi32>
    %51 = arith.andi %48, %50 : vector<16x16xi1>
    %c8_i32_16 = arith.constant 8 : i32
    %52 = vector.broadcast %c8_i32_16 : i32 to vector<16x16xi32>
    %53 = arith.cmpi sge, %30, %52 : vector<16x16xi32>
    %c8_i32_17 = arith.constant 8 : i32
    %54 = arith.addi %c8_i32_17, %46 : i32
    %55 = vector.broadcast %54 : i32 to vector<16x16xi32>
    %56 = arith.cmpi slt, %30, %55 : vector<16x16xi32>
    %57 = arith.andi %53, %56 : vector<16x16xi1>
    %58 = arith.andi %51, %57 : vector<16x16xi1>
    %59 = arith.ori %45, %58 : vector<16x16xi1>
    %cst_18 = arith.constant 0.000000e+00 : f32
    %cst_19 = arith.constant -1.000000e+06 : f32
    %60 = vector.broadcast %cst_18 : f32 to vector<16x16xf32>
    %61 = vector.broadcast %cst_19 : f32 to vector<16x16xf32>
    %62 = arith.select %59, %60, %61 : vector<16x16xi1>, vector<16x16xf32>
    %63 = tpu.concatenate %62, %62, %62, %62 in 0 : vector<16x16xf32>, vector<16x16xf32>, vector<16x16xf32>, vector<16x16xf32> -> vector<64x16xf32>
    %64 = tpu.iota {dimensions = array<i32: 1>} : vector<1x32xi32>
    %c0_i32_20 = arith.constant 0 : i32
    %65 = vector.broadcast %c0_i32_20 : i32 to vector<1x32xi32>
    %66 = arith.cmpi sge, %64, %65 : vector<1x32xi32>
    %c8_i32_21 = arith.constant 8 : i32
    %67 = vector.broadcast %c8_i32_21 : i32 to vector<1x32xi32>
    %68 = arith.cmpi slt, %64, %67 : vector<1x32xi32>
    %69 = arith.andi %66, %68 : vector<1x32xi1>
    %c8_i32_22 = arith.constant 8 : i32
    %70 = vector.broadcast %c8_i32_22 : i32 to vector<1x32xi32>
    %71 = arith.cmpi sge, %64, %70 : vector<1x32xi32>
    %c16_i32_23 = arith.constant 16 : i32
    %72 = vector.broadcast %c16_i32_23 : i32 to vector<1x32xi32>
    %73 = arith.cmpi slt, %64, %72 : vector<1x32xi32>
    %74 = arith.andi %71, %73 : vector<1x32xi1>
    %c16_i32_24 = arith.constant 16 : i32
    %75 = vector.broadcast %c16_i32_24 : i32 to vector<1x32xi32>
    %76 = arith.cmpi sge, %64, %75 : vector<1x32xi32>
    %c24_i32 = arith.constant 24 : i32
    %77 = vector.broadcast %c24_i32 : i32 to vector<1x32xi32>
    %78 = arith.cmpi slt, %64, %77 : vector<1x32xi32>
    %79 = arith.andi %76, %78 : vector<1x32xi1>
    %c24_i32_25 = arith.constant 24 : i32
    %80 = vector.broadcast %c24_i32_25 : i32 to vector<1x32xi32>
    %81 = arith.cmpi sge, %64, %80 : vector<1x32xi32>
    %c32_i32 = arith.constant 32 : i32
    %82 = vector.broadcast %c32_i32 : i32 to vector<1x32xi32>
    %83 = arith.cmpi slt, %64, %82 : vector<1x32xi32>
    %84 = arith.andi %81, %83 : vector<1x32xi1>
    %cst_26 = arith.constant 0.000000e+00 : f32
    %85 = vector.shape_cast %69 : vector<1x32xi1> to vector<1x32xi1>
    %86 = vector.broadcast %85 : vector<1x32xi1> to vector<16x32xi1>
    %87 = vector.broadcast %cst_26 : f32 to vector<16x32xf32>
    %88 = arith.select %86, %26, %87 : vector<16x32xi1>, vector<16x32xf32>
    %cst_27 = arith.constant 0.000000e+00 : f32
    %89 = vector.shape_cast %74 : vector<1x32xi1> to vector<1x32xi1>
    %90 = vector.broadcast %89 : vector<1x32xi1> to vector<16x32xi1>
    %91 = vector.broadcast %cst_27 : f32 to vector<16x32xf32>
    %92 = arith.select %90, %26, %91 : vector<16x32xi1>, vector<16x32xf32>
    %cst_28 = arith.constant 0.000000e+00 : f32
    %93 = vector.shape_cast %79 : vector<1x32xi1> to vector<1x32xi1>
    %94 = vector.broadcast %93 : vector<1x32xi1> to vector<16x32xi1>
    %95 = vector.broadcast %cst_28 : f32 to vector<16x32xf32>
    %96 = arith.select %94, %26, %95 : vector<16x32xi1>, vector<16x32xf32>
    %cst_29 = arith.constant 0.000000e+00 : f32
    %97 = vector.shape_cast %84 : vector<1x32xi1> to vector<1x32xi1>
    %98 = vector.broadcast %97 : vector<1x32xi1> to vector<16x32xi1>
    %99 = vector.broadcast %cst_29 : f32 to vector<16x32xf32>
    %100 = arith.select %98, %26, %99 : vector<16x32xi1>, vector<16x32xf32>
    %101 = tpu.concatenate %88, %92, %96, %100 in 0 : vector<16x32xf32>, vector<16x32xf32>, vector<16x32xf32>, vector<16x32xf32> -> vector<64x32xf32>
    %cst_30 = arith.constant dense<0.000000e+00> : vector<64x16xf32>
    %102 = tpu.matmul %101, %27, %cst_30 {dimension_numbers = #tpu.dot_dimension_numbers<[1], [1], [0], [0], [0, 0, 1, 0], [], []>} : vector<64x32xf32>, vector<16x32xf32>, vector<64x16xf32> -> vector<64x16xf32>
    %cst_31 = arith.constant 0.353553385 : f32
    %103 = vector.broadcast %cst_31 : f32 to vector<64x16xf32>
    %104 = arith.mulf %102, %103 : vector<64x16xf32>
    %105 = arith.addf %104, %63 : vector<64x16xf32>
    %cst_32 = arith.constant dense<0xFF800000> : vector<64xf32>
    %106 = vector.multi_reduction <maximumf>, %105, %cst_32 [1] : vector<64x16xf32> to vector<64xf32>
    %107 = vector.shape_cast %106 : vector<64xf32> to vector<64x1xf32>
    %108 = vector.broadcast %107 : vector<64x1xf32> to vector<64x16xf32>
    %109 = arith.subf %105, %108 : vector<64x16xf32>
    %110 = math.exp %109 : vector<64x16xf32>
    %cst_33 = arith.constant dense<0.000000e+00> : vector<64xf32>
    %111 = vector.multi_reduction <add>, %110, %cst_33 [1] : vector<64x16xf32> to vector<64xf32>
    %112 = vector.shape_cast %111 : vector<64xf32> to vector<64x1xf32>
    %113 = tpu.reciprocal %112 {approx = true} : vector<64x1xf32> -> vector<64x1xf32>
    %114 = vector.broadcast %113 : vector<64x1xf32> to vector<64x16xf32>
    %115 = arith.mulf %110, %114 : vector<64x16xf32>
    %cst_34 = arith.constant 0.000000e+00 : f32
    %116 = vector.broadcast %cst_34 : f32 to vector<16x32xf32>
    %cst_35 = arith.constant 0.000000e+00 : f32
    %117 = vector.shape_cast %69 : vector<1x32xi1> to vector<1x32xi1>
    %118 = vector.broadcast %117 : vector<1x32xi1> to vector<16x32xi1>
    %119 = vector.broadcast %cst_35 : f32 to vector<16x32xf32>
    %120 = arith.select %118, %28, %119 : vector<16x32xi1>, vector<16x32xf32>
    %121 = vector.extract_strided_slice %115 {offsets = [0, 0], sizes = [16, 16], strides = [1, 1]} : vector<64x16xf32> to vector<16x16xf32>
    %cst_36 = arith.constant dense<0.000000e+00> : vector<16x32xf32>
    %122 = tpu.matmul %121, %120, %cst_36 {dimension_numbers = #tpu.dot_dimension_numbers<[1], [0], [0], [1], [0, 0, 1, 1], [], []>} : vector<16x16xf32>, vector<16x32xf32>, vector<16x32xf32> -> vector<16x32xf32>
    %123 = arith.addf %116, %122 : vector<16x32xf32>
    %cst_37 = arith.constant 0.000000e+00 : f32
    %124 = vector.shape_cast %74 : vector<1x32xi1> to vector<1x32xi1>
    %125 = vector.broadcast %124 : vector<1x32xi1> to vector<16x32xi1>
    %126 = vector.broadcast %cst_37 : f32 to vector<16x32xf32>
    %127 = arith.select %125, %28, %126 : vector<16x32xi1>, vector<16x32xf32>
    %128 = vector.extract_strided_slice %115 {offsets = [16, 0], sizes = [16, 16], strides = [1, 1]} : vector<64x16xf32> to vector<16x16xf32>
    %cst_38 = arith.constant dense<0.000000e+00> : vector<16x32xf32>
    %129 = tpu.matmul %128, %127, %cst_38 {dimension_numbers = #tpu.dot_dimension_numbers<[1], [0], [0], [1], [0, 0, 1, 1], [], []>} : vector<16x16xf32>, vector<16x32xf32>, vector<16x32xf32> -> vector<16x32xf32>
    %130 = arith.addf %123, %129 : vector<16x32xf32>
    %cst_39 = arith.constant 0.000000e+00 : f32
    %131 = vector.shape_cast %79 : vector<1x32xi1> to vector<1x32xi1>
    %132 = vector.broadcast %131 : vector<1x32xi1> to vector<16x32xi1>
    %133 = vector.broadcast %cst_39 : f32 to vector<16x32xf32>
    %134 = arith.select %132, %28, %133 : vector<16x32xi1>, vector<16x32xf32>
    %135 = vector.extract_strided_slice %115 {offsets = [32, 0], sizes = [16, 16], strides = [1, 1]} : vector<64x16xf32> to vector<16x16xf32>
    %cst_40 = arith.constant dense<0.000000e+00> : vector<16x32xf32>
    %136 = tpu.matmul %135, %134, %cst_40 {dimension_numbers = #tpu.dot_dimension_numbers<[1], [0], [0], [1], [0, 0, 1, 1], [], []>} : vector<16x16xf32>, vector<16x32xf32>, vector<16x32xf32> -> vector<16x32xf32>
    %137 = arith.addf %130, %136 : vector<16x32xf32>
    %cst_41 = arith.constant 0.000000e+00 : f32
    %138 = vector.shape_cast %84 : vector<1x32xi1> to vector<1x32xi1>
    %139 = vector.broadcast %138 : vector<1x32xi1> to vector<16x32xi1>
    %140 = vector.broadcast %cst_41 : f32 to vector<16x32xf32>
    %141 = arith.select %139, %28, %140 : vector<16x32xi1>, vector<16x32xf32>
    %142 = vector.extract_strided_slice %115 {offsets = [48, 0], sizes = [16, 16], strides = [1, 1]} : vector<64x16xf32> to vector<16x16xf32>
    %cst_42 = arith.constant dense<0.000000e+00> : vector<16x32xf32>
    %143 = tpu.matmul %142, %141, %cst_42 {dimension_numbers = #tpu.dot_dimension_numbers<[1], [0], [0], [1], [0, 0, 1, 1], [], []>} : vector<16x16xf32>, vector<16x32xf32>, vector<16x32xf32> -> vector<16x32xf32>
    %144 = arith.addf %137, %143 : vector<16x32xf32>
    %c32 = arith.constant 32 : index
    %c0_43 = arith.constant 0 : index
    %145 = vector.load %arg4[%c32, %c0_43] : memref<288x128xf32, #tpu.memory_space<vmem>>, vector<32x32xf32>
    %c1_44 = arith.constant 1 : index
    %c0_45 = arith.constant 0 : index
    %146 = vector.load %arg5[%c1_44, %c0_45] : memref<32x128xf32, #tpu.memory_space<vmem>>, vector<1x32xf32>
    %cst_46 = arith.constant dense<0.000000e+00> : vector<16x32xf32>
    %147 = tpu.matmul %144, %145, %cst_46 {dimension_numbers = #tpu.dot_dimension_numbers<[1], [0], [0], [1], [0, 0, 1, 1], [], []>} : vector<16x32xf32>, vector<32x32xf32>, vector<16x32xf32> -> vector<16x32xf32>
    %148 = vector.broadcast %146 : vector<1x32xf32> to vector<16x32xf32>
    %149 = arith.addf %147, %148 : vector<16x32xf32>
    %150 = arith.addf %20, %149 : vector<16x32xf32>
    %c2 = arith.constant 2 : index
    %c0_47 = arith.constant 0 : index
    %151 = vector.load %arg5[%c2, %c0_47] : memref<32x128xf32, #tpu.memory_space<vmem>>, vector<1x32xf32>
    %c3 = arith.constant 3 : index
    %c0_48 = arith.constant 0 : index
    %152 = vector.load %arg5[%c3, %c0_48] : memref<32x128xf32, #tpu.memory_space<vmem>>, vector<1x32xf32>
    %cst_49 = arith.constant dense<0.000000e+00> : vector<16xf32>
    %153 = vector.multi_reduction <add>, %150, %cst_49 [1] : vector<16x32xf32> to vector<16xf32>
    %154 = vector.shape_cast %153 : vector<16xf32> to vector<16x1xf32>
    %cst_50 = arith.constant 3.200000e+01 : f32
    %155 = vector.broadcast %cst_50 : f32 to vector<16x1xf32>
    %156 = arith.divf %154, %155 : vector<16x1xf32>
    %157 = vector.broadcast %156 : vector<16x1xf32> to vector<16x32xf32>
    %158 = arith.subf %150, %157 : vector<16x32xf32>
    %159 = vector.broadcast %156 : vector<16x1xf32> to vector<16x32xf32>
    %160 = arith.subf %150, %159 : vector<16x32xf32>
    %161 = arith.mulf %158, %160 : vector<16x32xf32>
    %cst_51 = arith.constant dense<0.000000e+00> : vector<16xf32>
    %162 = vector.multi_reduction <add>, %161, %cst_51 [1] : vector<16x32xf32> to vector<16xf32>
    %163 = vector.shape_cast %162 : vector<16xf32> to vector<16x1xf32>
    %cst_52 = arith.constant 3.200000e+01 : f32
    %164 = vector.broadcast %cst_52 : f32 to vector<16x1xf32>
    %165 = arith.divf %163, %164 : vector<16x1xf32>
    %166 = vector.broadcast %156 : vector<16x1xf32> to vector<16x32xf32>
    %167 = arith.subf %150, %166 : vector<16x32xf32>
    %cst_53 = arith.constant 9.99999974E-6 : f32
    %168 = vector.broadcast %cst_53 : f32 to vector<16x1xf32>
    %169 = arith.addf %165, %168 : vector<16x1xf32>
    %170 = math.rsqrt %169 : vector<16x1xf32>
    %171 = vector.broadcast %170 : vector<16x1xf32> to vector<16x32xf32>
    %172 = arith.mulf %167, %171 : vector<16x32xf32>
    %173 = vector.broadcast %151 : vector<1x32xf32> to vector<16x32xf32>
    %174 = arith.mulf %172, %173 : vector<16x32xf32>
    %175 = vector.broadcast %152 : vector<1x32xf32> to vector<16x32xf32>
    %176 = arith.addf %174, %175 : vector<16x32xf32>
    %c64 = arith.constant 64 : index
    %c0_54 = arith.constant 0 : index
    %177 = vector.load %arg4[%c64, %c0_54] : memref<288x128xf32, #tpu.memory_space<vmem>>, vector<32x64xf32>
    %c4 = arith.constant 4 : index
    %c0_55 = arith.constant 0 : index
    %178 = vector.load %arg5[%c4, %c0_55] : memref<32x128xf32, #tpu.memory_space<vmem>>, vector<1x64xf32>
    %c96 = arith.constant 96 : index
    %c0_56 = arith.constant 0 : index
    %179 = vector.load %arg4[%c96, %c0_56] : memref<288x128xf32, #tpu.memory_space<vmem>>, vector<64x32xf32>
    %c5 = arith.constant 5 : index
    %c0_57 = arith.constant 0 : index
    %180 = vector.load %arg5[%c5, %c0_57] : memref<32x128xf32, #tpu.memory_space<vmem>>, vector<1x32xf32>
    %cst_58 = arith.constant dense<0.000000e+00> : vector<16x64xf32>
    %181 = tpu.matmul %176, %177, %cst_58 {dimension_numbers = #tpu.dot_dimension_numbers<[1], [0], [0], [1], [0, 0, 1, 1], [], []>} : vector<16x32xf32>, vector<32x64xf32>, vector<16x64xf32> -> vector<16x64xf32>
    %182 = vector.broadcast %178 : vector<1x64xf32> to vector<16x64xf32>
    %183 = arith.addf %181, %182 : vector<16x64xf32>
    %cst_59 = arith.constant 0.000000e+00 : f32
    %184 = vector.broadcast %cst_59 : f32 to vector<16x64xf32>
    %185 = arith.maximumf %183, %184 : vector<16x64xf32>
    %cst_60 = arith.constant dense<0.000000e+00> : vector<16x32xf32>
    %186 = tpu.matmul %185, %179, %cst_60 {dimension_numbers = #tpu.dot_dimension_numbers<[1], [0], [0], [1], [0, 0, 1, 1], [], []>} : vector<16x64xf32>, vector<64x32xf32>, vector<16x32xf32> -> vector<16x32xf32>
    %187 = vector.broadcast %180 : vector<1x32xf32> to vector<16x32xf32>
    %188 = arith.addf %186, %187 : vector<16x32xf32>
    %189 = arith.addf %176, %188 : vector<16x32xf32>
    %c6 = arith.constant 6 : index
    %c0_61 = arith.constant 0 : index
    %190 = vector.load %arg5[%c6, %c0_61] : memref<32x128xf32, #tpu.memory_space<vmem>>, vector<1x32xf32>
    %c7 = arith.constant 7 : index
    %c0_62 = arith.constant 0 : index
    %191 = vector.load %arg5[%c7, %c0_62] : memref<32x128xf32, #tpu.memory_space<vmem>>, vector<1x32xf32>
    %cst_63 = arith.constant dense<0.000000e+00> : vector<16xf32>
    %192 = vector.multi_reduction <add>, %189, %cst_63 [1] : vector<16x32xf32> to vector<16xf32>
    %193 = vector.shape_cast %192 : vector<16xf32> to vector<16x1xf32>
    %cst_64 = arith.constant 3.200000e+01 : f32
    %194 = vector.broadcast %cst_64 : f32 to vector<16x1xf32>
    %195 = arith.divf %193, %194 : vector<16x1xf32>
    %196 = vector.broadcast %195 : vector<16x1xf32> to vector<16x32xf32>
    %197 = arith.subf %189, %196 : vector<16x32xf32>
    %198 = vector.broadcast %195 : vector<16x1xf32> to vector<16x32xf32>
    %199 = arith.subf %189, %198 : vector<16x32xf32>
    %200 = arith.mulf %197, %199 : vector<16x32xf32>
    %cst_65 = arith.constant dense<0.000000e+00> : vector<16xf32>
    %201 = vector.multi_reduction <add>, %200, %cst_65 [1] : vector<16x32xf32> to vector<16xf32>
    %202 = vector.shape_cast %201 : vector<16xf32> to vector<16x1xf32>
    %cst_66 = arith.constant 3.200000e+01 : f32
    %203 = vector.broadcast %cst_66 : f32 to vector<16x1xf32>
    %204 = arith.divf %202, %203 : vector<16x1xf32>
    %205 = vector.broadcast %195 : vector<16x1xf32> to vector<16x32xf32>
    %206 = arith.subf %189, %205 : vector<16x32xf32>
    %cst_67 = arith.constant 9.99999974E-6 : f32
    %207 = vector.broadcast %cst_67 : f32 to vector<16x1xf32>
    %208 = arith.addf %204, %207 : vector<16x1xf32>
    %209 = math.rsqrt %208 : vector<16x1xf32>
    %210 = vector.broadcast %209 : vector<16x1xf32> to vector<16x32xf32>
    %211 = arith.mulf %206, %210 : vector<16x32xf32>
    %212 = vector.broadcast %190 : vector<1x32xf32> to vector<16x32xf32>
    %213 = arith.mulf %211, %212 : vector<16x32xf32>
    %214 = vector.broadcast %191 : vector<1x32xf32> to vector<16x32xf32>
    %215 = arith.addf %213, %214 : vector<16x32xf32>
    %c0_68 = arith.constant 0 : index
    %c0_69 = arith.constant 0 : index
    %216 = vector.load %arg6[%c0_68, %c0_69] : memref<16x32xf32, #tpu.memory_space<vmem>>, vector<16x32xf32>
    tpu.vector_store %arg6[%c0_68, %c0_69], %215 {strides = array<i32>} : memref<16x32xf32, #tpu.memory_space<vmem>>, vector<16x32xf32>,
    return
  }
  func.func @transform_0(%arg0: i32, %arg1: memref<2xi32, #tpu.memory_space<smem>>) -> (i32, i32) {
    %c0_i32 = arith.constant 0 : i32
    %c0_i32_0 = arith.constant 0 : i32
    %c0_i32_1 = arith.constant 0 : i32
    return %c0_i32, %c0_i32_0 : i32, i32
  }
  func.func @transform_1(%arg0: i32, %arg1: memref<2xi32, #tpu.memory_space<smem>>) -> (i32, i32) {
    %c0_i32 = arith.constant 0 : i32
    %c0_i32_0 = arith.constant 0 : i32
    %c0_i32_1 = arith.constant 0 : i32
    return %c0_i32, %c0_i32_0 : i32, i32
  }
  func.func @transform_2(%arg0: i32, %arg1: memref<2xi32, #tpu.memory_space<smem>>) -> (i32, i32) {
    %c0_i32 = arith.constant 0 : i32
    %c0_i32_0 = arith.constant 0 : i32
    %c0_i32_1 = arith.constant 0 : i32
    return %c0_i32, %c0_i32_0 : i32, i32
  }
  func.func @transform_3(%arg0: i32, %arg1: memref<2xi32, #tpu.memory_space<smem>>) -> (i32, i32) {
    %c0_i32 = arith.constant 0 : i32
    %c0_i32_0 = arith.constant 0 : i32
    %c0_i32_1 = arith.constant 0 : i32
    return %c0_i32, %c0_i32_0 : i32, i32
  }
  func.func @transform_4(%arg0: i32, %arg1: memref<2xi32, #tpu.memory_space<smem>>) -> (i32, i32) {
    %c0_i32 = arith.constant 0 : i32
    %c0_i32_0 = arith.constant 0 : i32
    %c0_i32_1 = arith.constant 0 : i32
    return %c0_i32, %c0_i32_0 : i32, i32
  }
}

</mosaic_0001>

<bundles_post_ra>
// kernel: bert_encoder_forward.1
= control target key start
LH: loop header
LB: loop body
LE: loop exit
PB: predicated region body
PF: predicated region fallthrough
CT: control target
= control target key end

     0   :  { %s2043_s0 = inlined_call_operand.vmem [shape: s32[2], index: 0, kind: input, shape index: {}]   ;;  %s2044_s1 = inlined_call_operand.vmem [shape: s32[16,1], index: 1, kind: input, shape index: {}]   ;;  %s2045_s2 = inlined_call_operand.vmem [shape: s32[16,1], index: 2, kind: input, shape index: {}]   ;;  %s2046_s3 = inlined_call_operand.hbm [shape: f32[288,128], index: 3, kind: input, shape index: {}]   ;;  %s2047_s4 = inlined_call_operand.vmem [shape: f32[32,128], index: 4, kind: input, shape index: {}]   ;;  %s2048_s5 = inlined_call_operand.hbm [shape: f32[16,32], index: 5, kind: output, shape index: {}]  }
   0x1   :  { %s10_s20 = sshll.u32 %s2043_s0, 4  ;;  %s11_s20 = int_to_ptr.vmem [resolvable:$true] %s10_s20 }
   0x2   :  { %s1717_s21 = scalar_lea.vmem %s11_s20, 16  ;;  %p1722_p1 = scmp.lt.s32.totalorder %s11_s20, %s11_s20 }
   0x3   :  { %p1718_p0 = scmp.ne.s32.totalorder %s11_s20, %s1717_s21  ;;  %p1723_p2 = scmp.lt.s32.totalorder %s1717_s21, %s1717_s21 }
   0x5   :  { %p1724_p3 = por %p1723_p2, %p1722_p1 }
   0x7   :  { %p1725_p4 = pnand %p1724_p3, %p1718_p0 }
   0x9   :  { %1728 = shalt.err (!%p1725_p4)  }
   0xa   :  { %s1779_s22 = smov [#allocation3]  }
   0xb   :  { %13 = dma.vmem_to_smem %s11_s20, 16, %s1779_s22, [#allocation2] }
   0xc   :  { %1773 = dma.done.wait [#allocation2], 16 }
   0xd   :  { %1774 = vsyncadd [#allocation2], 4294967280 }
   0xe   :  { %15 = sfence }
   0xf   :  { %16 = vsyncpa [#allocation5], 0 }
  0x10   :  { %17 = vsyncpa [#allocation6], 0  ;;  %s1780_s23 = smov [#allocation4]   ;;  %s1729_s26 = scalar_lea.hbm %s2046_s3, 4608 }
  0x11   :  { %s27_s24 = sshll.u32 %s1780_s23, 4  ;;  %p1730_p5 = scmp.ne.s32.totalorder %s2046_s3, %s1729_s26  ;;  %s28_s24 = int_to_ptr.vmem [resolvable:$true] %s27_s24 }
  0x12   :  { %p1733_p6 = scmp.lt.u32.totalorder %s1729_s26, %s2046_s3 }
  0x14   :  { %p1735_p7 = pnand %p1733_p6, %p1730_p5 }
  0x16   :  { %1738 = shalt.err (!%p1735_p7)
}
  0x17   :  { %s1739_s6 = scalar_lea.vmem %s28_s24, 4608  ;;  %p1744_p9 = scmp.lt.s32.totalorder %s28_s24, %s28_s24 }
  0x18   :  { %p1740_p8 = scmp.ne.s32.totalorder %s28_s24, %s1739_s6  ;;  %p1745_p10 = scmp.lt.s32.totalorder %s1739_s6, %s1739_s6 }
  0x1a   :  { %p1746_p11 = por %p1745_p10, %p1744_p9 }
  0x1c   :  { %p1747_p12 = pnand %p1746_p11, %p1740_p8 }
  0x1e   :  { %1750 = shalt.err (!%p1747_p12)
}
  0x1f   :  { %s1781_s7 = smov 128   ;;  %s1782_s8 = smov 8  }
  0x20   :  { %33 = dma.hbm_to_vmem [thread:$0]  %s2046_s3, 4608, %s28_s24, [#allocation5], %s1781_s7, %s1781_s7, %s1782_s8  }
  0x21   :  { %1775 = dma.done.wait [#allocation5], 4608  }
  0x22   :  { %1776 = vsyncadd [#allocation5], 4294962688  ;;  %v1783_v0 = vmov 0   ;;  %v39_v1 = vld [vmem:[%s2044_s1] sm:$0xff]  ;;  %v56_v3 = vld [vmem:[#allocation4 + $0xa8] sm:$0xff]  ;;  %v41_v31 = vlaneseq  ;;  %v1784_v34 = vmov 1.0  }
  0x23   :  { %1665 = vset.pattern.permute.xlu0 %v1783_v0  ;;  %1666 = vset.pattern.permute.xlu1 %v1783_v0  ;;  %v55_v2 = vld [vmem:[#allocation4 + $0xa0] sm:$0xff]  ;;  %v57_v4 = vld [vmem:[#allocation4 + $0xb0] sm:$0xff]  ;;  %v58_v5 = vld [vmem:[#allocation4 + $0xb8] sm:$0xff]  ;;  %vm188_vm2 = vcmask 261120   ;;  %s1785_s0 = smov 96   ;;  %s1304_s26 = sld [smem:[#allocation3 + $0x1]] }
  0x24   :  { %44 = vperm.xlu0 %1665, %v39_v1   ;;  %v40_v6 = vld [vmem:[%s2044_s1 + $0x8] sm:$0xff]  ;;  %v1547_v7 = vpack.c.bf16 %v56_v3, %v55_v2  ;;  %v1551_v8 = vpack.c.bf16 %v58_v5, %v57_v4  ;;  %v59_v9 = vld [vmem:[#allocation4 + $0xc0] sm:$0xff]  ;;  %v61_v14 = vld [vmem:[#allocation4 + $0xd0] sm:$0xff]  ;;  %v1849_v32 = vand.u32 127, %v41_v31  ;;  %v78_v42 = vshrl.u32 %v41_v31, 7  ;;  %s273_s27 = sld [smem:[#allocation3]] }
  0x25   :  { %v60_v10 = vld [vmem:[#allocation4 + $0xc8] sm:$0xff]  ;;  %v71_v12 = vld [vmem:[%s2045_s2] sm:$0xff]  ;;  %v62_v15 = vld [vmem:[#allocation4 + $0xd8] sm:$0xff]  ;;  %s1787_s29 = smov 64   ;;  %s1788_s18 = smov [#allocation7]  }
  0x26   :  { %1548 = vmatprep.subr.bf16.mxu0 %v1547_v7  ;;  %v1555_v11 = vpack.c.bf16 %v60_v10, %v59_v9  ;;  %v72_v13 = vld [vmem:[%s2045_s2 + $0x8] sm:$0xff]  ;;  %v73_v16 = vcvt.s32.f32 %v71_v12  ;;  %v1559_v18 = vpack.c.bf16 %v62_v15, %v61_v14  ;;  %v63_v19 = vld [vmem:[#allocation4 + $0xe0] sm:$0xff]  ;;  %v65_v22 = vld [vmem:[#allocation4 + $0xf0] sm:$0xff]  ;;  %v79_v46 = vsub.s32 0, %v78_v42  ;;  %s1285_s19 = sshll.u32 %s1788_s18, 4  ;;  %s1286_s19 = int_to_ptr.vmem [resolvable:$true] %s1285_s19 }
  0x27   :  { %1550 = vmatpush3.bf16.msra.mxu0 %v1547_v7  ;;  %v74_v17 = vcvt.s32.f32 %v72_v13  ;;  %v64_v20 = vld [vmem:[#allocation4 + $0xe8] sm:$0xff]  ;;  %v66_v23 = vld [vmem:[#allocation4 + $0xf8] sm:$0xff]  ;;  %v67_v25 = vld [vmem:[#allocation4 + $0x100] sm:$0xff]  ;;  %vm304_vm3 = vcmp.lt.s32.totalorder %v1849_v32, 8  ;;  %vm293_vm5 = vcmp.ge.s32.totalorder %v1849_v32, 8  ;;  %vm306_vm6 = vcmp.lt.s32.totalorder %v1849_v32, 16  ;;  %p1756_p0 = scmp.lt.s32.totalorder %s1286_s19, %s1286_s19 }
  0x28   :  { %47 = vperm.xlu0 %1665, %v40_v6   ;;  %1552 = vmatprep.subr.bf16.mxu0 %v1551_v8  ;;  %v1563_v21 = vpack.c.bf16 %v64_v20, %v63_v19  ;;  %v1567_v24 = vpack.c.bf16 %v66_v23, %v65_v22  ;;  %v68_v26 = vld [vmem:[#allocation4 + $0x108] sm:$0xff]  ;;  %v69_v28 = vld [vmem:[#allocation4 + $0x110] sm:$0xff]  ;;  %v70_v29 = vld [vmem:[#allocation4 + $0x118] sm:$0xff]  ;;  %vm308_vm8 = vcmp.ge.s32.totalorder %v1849_v32, 16  ;;  %vm309_vm9 = vcmp.lt.s32.totalorder %v1849_v32, 24  ;;  %s1751_s20 = scalar_lea.vmem %s1286_s19, 256 }
  0x29   :  { %159 = vperm.xlu1 %1666, %v73_v16   ;;  %v1571_v27 = vpack.c.bf16 %v68_v26, %v67_v25  ;;  %v1575_v30 = vpack.c.bf16 %v70_v29, %v69_v28  ;;  %v179_v36 = vld [vmem:[#allocation4] sm:$0xff]  ;;  %v180_v37 = vld [vmem:[#allocation4 + $0x8] sm:$0xff]  ;;  %v181_v39 = vld [vmem:[#allocation4 + $0x10] sm:$0xff]  ;;  %vm311_vm11 = vcmp.ge.s32.totalorder %v1849_v32, 24  ;;  %vm312_vm12 = vcmp.lt.s32.totalorder %v1849_v32, 32  ;;  %s294_s28 = sadd.s32 8, %s1304_s26  ;;  %p1752_p13 = scmp.ne.s32.totalorder %s1286_s19, %s1751_s20 }
  0x2a   :  { %v1579_v38 = vpack.c.bf16 %v180_v37, %v179_v36  ;;  %v182_v40 = vld [vmem:[#allocation4 + $0x18] sm:$0xff]  ;;  %v175_v58 = vld [vmem:[%s2047_s4 + $0x8] sm:$0xff]  ;;  %v176_v59 = vld [vmem:[%s2047_s4 + $0x10] sm:$0xff]  ;;  %v295_v20 = vstv %s294_s28  ;;  %v281_v22 = vstv %s273_s27  ;;  %p1757_p1 = scmp.lt.s32.totalorder %s1751_s20, %s1751_s20 }
  0x2b   :  { %1554 = vmatpush3.bf16.msra.mxu0 %v1551_v8  ;;  %v1583_v41 = vpack.c.bf16 %v182_v40, %v181_v39  ;;  %v75_v43 = vld [vmem:[%s2047_s4 + $0x18] sm:$0x1]  ;;  %v76_v44 = vld [vmem:[%s2047_s4 + $0x19] sm:$0x1]  ;;  %v1301_v63 = vld [vmem:[%s2047_s4] ss:$0 sm:$0xff]  ;;  %vm296_vm14 = vcmp.lt.s32.totalorder %v1849_v32, %v295_v20 }
  0x2c   :  { %1556 = vmatprep.subr.bf16.mxu0 %v1555_v11  ;;  %v156_v47 = vsub.f32 %v76_v44, %v75_v43  ;;  %v80_v49 = vrot.slane %v75_v43, %v79_v46  ;;  %vm1588_vm4 = vmpackc.low %vm188_vm2, %vm188_vm2  ;;  %p1758_p2 = por %p1757_p1, %p1756_p0 }
  0x2d   :  { %164 = vperm.xlu1 %1666, %v74_v17   ;;  %vm1889_vm7 = vmand %vm293_vm5, %vm306_vm6 }
  0x2e   :  { %v170_v48 = vrot.slane %v156_v47, %v79_v46  ;;  %vm1901_vm10 = vmand %vm308_vm8, %vm309_vm9  ;;  %p1759_p3 = pnand %p1758_p2, %p1752_p13 }
  0x2f   :  { %1558 = vmatpush3.bf16.msra.mxu0 %v1555_v11  ;;  %vm1913_vm13 = vmand %vm311_vm11, %vm312_vm12 }
  0x30   :  { %1560 = vmatprep.subr.bf16.mxu0 %v1559_v18  ;;  %vm297_vm15 = vmand %vm293_vm5, %vm296_vm14 }
  0x31   :  { %vm1600_vm5 = vmpackc.low %vm304_vm3, %vm304_vm3 }
  0x32   :  { %vm1606_vm6 = vmpackc.low %vm1901_vm10, %vm1901_vm10 }
  0x33   :  { %1562 = vmatpush3.bf16.msra.mxu0 %v1559_v18 }
  0x34   :  { %1564 = vmatprep.subr.bf16.mxu0 %v1563_v21 }
  0x37   :  { %1566 = vmatpush3.bf16.msra.mxu0 %v1563_v21 }
  0x38   :  { %1568 = vmatprep.subr.bf16.mxu0 %v1567_v24 }
  0x3b   :  { %1570 = vmatpush3.bf16.msra.mxu0 %v1567_v24 }
  0x3c   :  { %1572 = vmatprep.subr.bf16.mxu0 %v1571_v27 }
  0x3f   :  { %1574 = vmatpush3.bf16.msra.mxu0 %v1571_v27 }
  0x40   :  { %1576 = vmatprep.subr.bf16.mxu0 %v1575_v30 }
  0x43   :  { %1578 = vmatpush3.bf16.msra.mxu0 %v1575_v30  ;;  %v1786_v30 = vmov -1000000.0  }
  0x44   :  { %1580 = vmatprep.subr.bf16.mxu0 %v1579_v38  ;;  %v303_v31 = vsel %vm297_vm15, 0.0, %v1786_v30 }
  0xa3   :  { %v45_v33 = vpop.permute.xlu0 %44 }
  0xa4   :  { %vm49_vm0 = vcmp.eq.s32.totalorder %v1849_v32, %v45_v33 }
  0xa5   :  { %1448 = vmatprep.mubr.msk.f32.mxu0 %vm49_vm0, %v1784_v34  ;;  %vm282_vm0 = vcmp.lt.s32.totalorder %v1849_v32, %v281_v22 }
  0xa6   :  { %v302_v33 = vsel %vm282_vm0, 0.0, %v1786_v30 }
  0xa7   :  { %v48_v35 = vpop.permute.xlu0 %47 }
  0xa8   :  { %vm50_vm1 = vcmp.eq.s32.totalorder %v1849_v32, %v48_v35  ;;  %v160_v45 = vpop.permute.xlu1 %159 }
  0xa9   :  { %1449 = vmatmul.mubr.msk.f32.vlgmr.msra.gmra.mrb[0].mxu0 %vm50_vm1, %v1784_v34  ;;  %v171_v55 = vmul.f32 %v170_v48, %v160_v45  ;;  %vm485_vm1 = vcmask 130048  }
  0xaa   :  { %1582 = vmatpush3.bf16.msra.mxu0 %v1579_v38 }
  0xab   :  { %1584 = vmatprep.subr.bf16.mxu0 %v1583_v41 }
  0xac   :  { %v165_v50 = vpop.permute.xlu1 %164 }
  0xad   :  { %v172_v52 = vmul.f32 %v170_v48, %v165_v50 }
  0xae   :  { %1586 = vmatpush3.bf16.msra.mxu0 %v1583_v41 }
 0x17c   :  { %v1450_v51 = vpop.f32.mrb[0].mxu0 }
 0x17d   :  { %v153_v53 = vadd.f32 %v1450_v51, %v80_v49  ;;  %v147_v54 = vpop.f32.mrb[1].mxu0 }
 0x17e   :  { %v148_v56 = vadd.f32 %v147_v54, %v80_v49 }
 0x17f   :  { %v174_v57 = vadd.f32 %v172_v52, %v153_v53 }
 0x180   :  { %v173_v60 = vadd.f32 %v171_v55, %v148_v56 }
 0x181   :  { %v1867_v62 = vadd.f32 %v176_v59, %v174_v57 }
 0x182   :  { %v1865_v61 = vadd.f32 %v175_v58, %v173_v60 }
 0x184   :  { %1459 = vmatprep.mubr.msk.f32.mxu0 %vm188_vm2, %v1865_v61 }
 0x185   :  { %1460 = vmatmul.mubr.msk.f32.vlgmr.msra.gmra.mrb[2].mxu0 %vm188_vm2, %v1867_v62 }
 0x258   :  { %v1461_v0 = vpop.f32.mrb[2].mxu0 }
 0x259   :  { %v267_v1 = vadd.f32 %v1461_v0, %v1301_v63  ;;  %v261_v2 = vpop.f32.mrb[3].mxu0 }
 0x25a   :  { %v262_v3 = vadd.f32 %v1301_v63, %v261_v2 }
 0x25b   :  { %v317_v11 = vsel %vm304_vm3, %v267_v1, 0.0  ;;  %v321_v14 = vsel %vm1889_vm7, %v267_v1, 0.0  ;;  %v325_v17 = vsel %vm1901_vm10, %v267_v1, 0.0  ;;  %v329_v19 = vsel %vm1913_vm13, %v267_v1, 0.0 }
 0x25c   :  { %v316_v4 = vsel %vm304_vm3, %v262_v3, 0.0  ;;  %v1879_v5 = vpack.i.bf16 %v267_v1, %v262_v3  ;;  %v320_v12 = vsel %vm1889_vm7, %v262_v3, 0.0  ;;  %v324_v15 = vsel %vm1901_vm10, %v262_v3, 0.0  ;;  %vm1612_vm3 = vmpackc.low %vm1913_vm13, %vm1913_vm13 }
 0x25d   :  { %1466 = vmatprep.mubr.msk.f32.mxu1 %vm188_vm2, %v316_v4  ;;  %v328_v18 = vsel %vm1913_vm13, %v262_v3, 0.0 }
 0x25e   :  { %1668 = vrot.lane.b32.xlu0 %v1879_v5, %s1785_s0 }
 0x2d0   :  { %v1669_v6 = vpop.permute.xlu0 %1668 }
 0x2d1   :  { %v1671_v7 = vunpack.i.h.bf16 %v1669_v6  ;;  %v1670_v8 = vunpack.i.l.bf16 %v1669_v6 }
 0x2d3   :  { %v1587_v9 = vpack.c.bf16 %v1671_v7, %v1670_v8 }
 0x2d5   :  { %1589 = vmatprep.subr.msk.bf16.mxu1 %vm1588_vm4, %v1587_v9 }
 0x2d6   :  { %1592 = vmatpush3.bf16.xpose.msk.msra.mxu1 %vm1588_vm4, %v1587_v9  ;;  %vm1594_vm4 = vmpackc.low %vm1889_vm7, %vm1889_vm7  ;;  %vm1154_vm7 = vcmask 523264  }
 0x2dd   :  { %1467 = vmatmul.mubr.msk.f32.vlgmr.msra.gmra.mrb[0].mxu1 %vm188_vm2, %v317_v11 }
 0x2de   :  { %1469 = vmatprep.mubr.msk.f32.mxu1 %vm188_vm2, %v320_v12 }
 0x2e1   :  { %1470 = vmatmul.mubr.msk.f32.gmra.mrb[2].mxu1 %vm188_vm2, %v321_v14 }
 0x2e2   :  { %1472 = vmatprep.mubr.msk.f32.mxu1 %vm188_vm2, %v324_v15 }
 0x2e5   :  { %1473 = vmatmul.mubr.msk.f32.gmra.mrb[4].mxu1 %vm188_vm2, %v325_v17 }
 0x2e6   :  { %1475 = vmatprep.mubr.msk.f32.mxu1 %vm188_vm2, %v328_v18 }
 0x2e9   :  { %1476 = vmatmul.mubr.msk.f32.gmra.mrb[6].mxu1 %vm188_vm2, %v329_v19 }
 0x3b0   :  { %v1468_v21 = vpop.f32.mrb[0].mxu1 }
 0x3b1   :  { %v430_v23 = vpop.f32.mrb[1].mxu1  ;;  %v470_v28 = vmul.f32 0.35355338, %v1468_v21 }
 0x3b2   :  { %v469_v25 = vmul.f32 0.35355338, %v430_v23 }
 0x3b3   :  { %v478_v43 = vadd.f32 %v470_v28, %v303_v31 }
 0x3b4   :  { %v1471_v24 = vpop.f32.mrb[2].mxu1  ;;  %v477_v39 = vadd.f32 %v469_v25, %v302_v33 }
 0x3b5   :  { %v472_v26 = vmul.f32 0.35355338, %v1471_v24  ;;  %v440_v27 = vpop.f32.mrb[3].mxu1  ;;  %v489_v50 = vsel %vm485_vm1, %v478_v43, -inf }
 0x3b6   :  { %v471_v29 = vmul.f32 0.35355338, %v440_v27  ;;  %v486_v46 = vsel %vm485_vm1, %v477_v39, -inf }
 0x3b7   :  { %v480_v34 = vadd.f32 %v472_v26, %v303_v31 }
 0x3b8   :  { %v1474_v35 = vpop.f32.mrb[4].mxu1  ;;  %v479_v36 = vadd.f32 %v471_v29, %v302_v33 }
 0x3b9   :  { %v450_v37 = vpop.f32.mrb[5].mxu1  ;;  %v495_v38 = vsel %vm485_vm1, %v480_v34, -inf  ;;  %v474_v40 = vmul.f32 0.35355338, %v1474_v35 }
 0x3ba   :  { %v473_v41 = vmul.f32 0.35355338, %v450_v37  ;;  %496 = vmax.xlane.f32.xlu0 %v495_v38  ;;  %v492_v42 = vsel %vm485_vm1, %v479_v36, -inf }
 0x3bb   :  { %493 = vmax.xlane.f32.xlu1 %v492_v42  ;;  %v482_v51 = vadd.f32 %v474_v40, %v303_v31  ;;  %v917_v42 = vld [vmem:[#allocation4 + $0x28] sm:$0xff] }
 0x3bc   :  { %v1477_v44 = vpop.f32.mrb[6].mxu1  ;;  %v481_v47 = vadd.f32 %v473_v41, %v302_v33  ;;  %v916_v41 = vld [vmem:[#allocation4 + $0x20] sm:$0xff] }
 0x3bd   :  { %v460_v45 = vpop.f32.mrb[7].mxu1  ;;  %v476_v48 = vmul.f32 0.35355338, %v1477_v44  ;;  %v501_v54 = vsel %vm485_vm1, %v482_v51, -inf  ;;  %v1617_v44 = vpack.c.bf16 %v917_v42, %v916_v41  ;;  %v1057_v42 = vld [vmem:[#allocation4 + $0x78] sm:$0xff] }
 0x3be   :  { %v475_v49 = vmul.f32 0.35355338, %v460_v45  ;;  %487 = vmax.xlane.f32.xlu0 %v486_v46  ;;  %v498_v52 = vsel %vm485_vm1, %v481_v47, -inf  ;;  %v919_v45 = vld [vmem:[#allocation4 + $0x38] sm:$0xff] }
 0x3bf   :  { %490 = vmax.xlane.f32.xlu1 %v489_v50  ;;  %v484_v55 = vadd.f32 %v476_v48, %v303_v31  ;;  %1618 = vmatprep.subr.bf16.mxu0 %v1617_v44 }
 0x3c0   :  { %v483_v53 = vadd.f32 %v475_v49, %v302_v33  ;;  %1620 = vmatpush3.bf16.msra.mxu0 %v1617_v44  ;;  %v1058_v44 = vld [vmem:[#allocation4 + $0x80] sm:$0xff] }
 0x3c1   :  { %v507_v57 = vsel %vm485_vm1, %v484_v55, -inf }
 0x3c2   :  { %499 = vmax.xlane.f32.xlu0 %v498_v52  ;;  %v504_v56 = vsel %vm485_vm1, %v483_v53, -inf }
 0x3c3   :  { %502 = vmax.xlane.f32.xlu1 %v501_v54 }
 0x3c6   :  { %505 = vmax.xlane.f32.xlu0 %v504_v56 }
 0x3c7   :  { %508 = vmax.xlane.f32.xlu1 %v507_v57 }
 0x447   :  { %v497_v58 = vpop.xlane.xlu0 %496 }
 0x448   :  { %v513_v59 = vsub.f32 %v480_v34, %v497_v58  ;;  %v494_v60 = vpop.xlane.xlu1 %493 }
 0x449   :  { %v512_v0 = vsub.f32 %v479_v36, %v494_v60 }
 0x44a   :  { %v524_v63 = vmul.f32 1.442695, %v513_v59 }
 0x44b   :  { %v488_v1 = vpop.xlane.xlu0 %487  ;;  %v522_v6 = vmul.f32 1.442695, %v512_v0 }
 0x44c   :  { %1677 = vpow2.f32 %v524_v63  ;;  %v510_v2 = vsub.f32 %v477_v39, %v488_v1  ;;  %v491_v3 = vpop.xlane.xlu1 %490 }
 0x44d   :  { %v511_v4 = vsub.f32 %v478_v43, %v491_v3  ;;  %v918_v43 = vld [vmem:[#allocation4 + $0x30] sm:$0xff] }
 0x44e   :  { %v518_v7 = vmul.f32 1.442695, %v510_v2  ;;  %v1621_v46 = vpack.c.bf16 %v919_v45, %v918_v43  ;;  %v1059_v45 = vld [vmem:[#allocation4 + $0x88] sm:$0xff] }
 0x44f   :  { %v520_v8 = vmul.f32 1.442695, %v511_v4  ;;  %v500_v9 = vpop.xlane.xlu0 %499 }
 0x450   :  { %1679 = vpow2.f32 %v518_v7  ;;  %v514_v11 = vsub.f32 %v481_v47, %v500_v9  ;;  %v503_v12 = vpop.xlane.xlu1 %502  ;;  %1622 = vmatprep.subr.bf16.mxu0 %v1621_v46 }
 0x451   :  { %1681 = vpow2.f32 %v520_v8  ;;  %v515_v14 = vsub.f32 %v482_v51, %v503_v12  ;;  %1624 = vmatpush3.bf16.msra.mxu0 %v1621_v46  ;;  %v1331_v12 = vld [vmem:[%s2047_s4 + $0x1] ss:$0 sm:$0xff]  ;;  %v1641_v46 = vpack.c.bf16 %v1059_v45, %v1058_v44 }
 0x452   :  { %1683 = vpow2.f32 %v522_v6  ;;  %v526_v15 = vmul.f32 1.442695, %v514_v11 }
 0x453   :  { %v528_v17 = vmul.f32 1.442695, %v515_v14  ;;  %v506_v18 = vpop.xlane.xlu0 %505 }
 0x454   :  { %v516_v19 = vsub.f32 %v483_v53, %v506_v18  ;;  %v509_v20 = vpop.xlane.xlu1 %508 }
 0x455   :  { %1685 = vpow2.f32 %v528_v17  ;;  %v517_v21 = vsub.f32 %v484_v55, %v509_v20 }
 0x456   :  { %v1938_v22 = vpop.eup %1677  ;;  %1687 = vpow2.f32 %v526_v15  ;;  %v530_v23 = vmul.f32 1.442695, %v516_v19 }
 0x457   :  { %v532_v24 = vmul.f32 1.442695, %v517_v21  ;;  %v543_v25 = vsel %vm485_vm1, %v1938_v22, 0.0 }
 0x458   :  { %1689 = vpow2.f32 %v530_v23  ;;  %544 = vadd.xlane.f32.xlu1 %v543_v25 }
 0x459   :  { %1691 = vpow2.f32 %v532_v24 }
 0x45a   :  { %v1680_v26 = vpop.eup %1679 }
 0x45b   :  { %v1942_v27 = vpop.eup %1681  ;;  %v534_v28 = vsel %vm485_vm1, %v1680_v26, 0.0 }
 0x45c   :  { %v1684_v29 = vpop.eup %1683  ;;  %535 = vadd.xlane.f32.xlu0 %v534_v28  ;;  %v537_v30 = vsel %vm485_vm1, %v1942_v27, 0.0 }
 0x45d   :  { %538 = vadd.xlane.f32.xlu1 %v537_v30  ;;  %v540_v33 = vsel %vm485_vm1, %v1684_v29, 0.0 }
 0x45f   :  { %v1947_v31 = vpop.eup %1685 }
 0x460   :  { %v1950_v34 = vpop.eup %1687  ;;  %541 = vadd.xlane.f32.xlu0 %v540_v33  ;;  %v549_v35 = vsel %vm485_vm1, %v1947_v31, 0.0  ;;  %v1049_v33 = vld [vmem:[#allocation4 + $0x40] sm:$0xff] }
 0x461   :  { %550 = vadd.xlane.f32.xlu1 %v549_v35  ;;  %v546_v37 = vsel %vm485_vm1, %v1950_v34, 0.0  ;;  %v1051_v35 = vld [vmem:[#allocation4 + $0x50] sm:$0xff] }
 0x462   :  { %v1954_v36 = vpop.eup %1689 }
 0x463   :  { %v552_v38 = vsel %vm485_vm1, %v1954_v36, 0.0  ;;  %v1960_v39 = vpop.eup %1691 }
 0x464   :  { %547 = vadd.xlane.f32.xlu0 %v546_v37  ;;  %v555_v40 = vsel %vm485_vm1, %v1960_v39, 0.0 }
 0x465   :  { %553 = vadd.xlane.f32.xlu1 %v552_v38  ;;  %v1054_v38 = vld [vmem:[#allocation4 + $0x60] sm:$0xff] }
 0x469   :  { %556 = vadd.xlane.f32.xlu1 %v555_v40  ;;  %v1056_v40 = vld [vmem:[#allocation4 + $0x70] sm:$0xff] }
 0x46a   :  { %v1637_v43 = vpack.c.bf16 %v1057_v42, %v1056_v40 }
 0x47a   :  { %1673 = vrot.lane.b32.xlu0 %v1879_v5, %s1787_s29 }
 0x4e5   :  { %v545_v48 = vpop.xlane.xlu1 %544 }
 0x4e9   :  { %v536_v47 = vpop.xlane.xlu0 %535 }
 0x4ea   :  { %v539_v50 = vpop.xlane.xlu1 %538 }
 0x4ed   :  { %v542_v49 = vpop.xlane.xlu0 %541 }
 0x4ee   :  { %1693 = vrcp.f32 %v542_v49  ;;  %v551_v54 = vpop.xlane.xlu1 %550 }
 0x4ef   :  { %1695 = vrcp.f32 %v545_v48 }
 0x4f0   :  { %1697 = vrcp.f32 %v536_v47 }
 0x4f1   :  { %v548_v51 = vpop.xlane.xlu0 %547  ;;  %1699 = vrcp.f32 %v539_v50 }
 0x4f2   :  { %1701 = vrcp.f32 %v548_v51  ;;  %v554_v10 = vpop.xlane.xlu1 %553 }
 0x4f3   :  { %1703 = vrcp.f32 %v551_v54 }
 0x4f4   :  { %1705 = vrcp.f32 %v554_v10 }
 0x4f5   :  { %v1674_v52 = vpop.permute.xlu0 %1673 }
 0x4f6   :  { %v1676_v5 = vunpack.i.h.bf16 %v1674_v52  ;;  %v1675_v53 = vunpack.i.l.bf16 %v1674_v52  ;;  %v557_v2 = vpop.xlane.xlu1 %556 }
 0x4f7   :  { %1707 = vrcp.f32 %v557_v2 }
 0x4f8   :  { %v1694_v55 = vpop.eup %1693  ;;  %v1593_v56 = vpack.c.bf16 %v1676_v5, %v1675_v53  ;;  %v1334_v53 = vld [vmem:[%s2047_s4 + $0x2] ss:$0 sm:$0xff] }
 0x4f9   :  { %v1696_v57 = vpop.eup %1695  ;;  %v568_v58 = vmul.f32 %v1694_v55, %v1684_v29  ;;  %v1335_v55 = vld [vmem:[%s2047_s4 + $0x3] ss:$0 sm:$0xff] }
 0x4fa   :  { %v1698_v59 = vpop.eup %1697  ;;  %1595 = vmatprep.subr.msk.bf16.mxu1 %vm1594_vm4, %v1593_v56  ;;  %v569_v60 = vmul.f32 %v1696_v57, %v1938_v22 }
 0x4fb   :  { %1598 = vmatpush3.bf16.msk.msra.mxu1 %vm1594_vm4, %v1593_v56  ;;  %1482 = vmatprep.mubr.msk.f32.mxu1 %vm485_vm1, %v568_v58  ;;  %v566_v63 = vmul.f32 %v1698_v59, %v1680_v26  ;;  %v1700_v32 = vpop.eup %1699 }
 0x4fc   :  { %1601 = vmatprep.subr.msk.bf16.mxu1 %vm1600_vm5, %v1593_v56  ;;  %v1702_v0 = vpop.eup %1701  ;;  %v567_v1 = vmul.f32 %v1700_v32, %v1942_v27  ;;  %v1061_v32 = vld [vmem:[#allocation4 + $0x98] sm:$0xff] }
 0x4fd   :  { %v570_v3 = vmul.f32 %v1702_v0, %v1950_v34  ;;  %v1704_v13 = vpop.eup %1703 }
 0x4fe   :  { %1483 = vmatmul.mubr.msk.f32.vlgmr.msra.gmra.mrb[8].mxu1 %vm485_vm1, %v569_v60  ;;  %v1706_v4 = vpop.eup %1705  ;;  %v571_v6 = vmul.f32 %v1704_v13, %v1947_v31 }
 0x4ff   :  { %1604 = vmatpush3.bf16.msk.msra.mxu1 %vm1600_vm5, %v1593_v56  ;;  %1489 = vmatprep.mubr.msk.f32.mxu1 %vm485_vm1, %v566_v63  ;;  %v572_v7 = vmul.f32 %v1706_v4, %v1954_v36  ;;  %v1052_v36 = vld [vmem:[#allocation4 + $0x58] sm:$0xff]  ;;  %v1060_v63 = vld [vmem:[#allocation4 + $0x90] sm:$0xff] }
 0x500   :  { %1607 = vmatprep.subr.msk.bf16.mxu1 %vm1606_vm6, %v1593_v56  ;;  %v1629_v37 = vpack.c.bf16 %v1052_v36, %v1051_v35  ;;  %v1645_v0 = vpack.c.bf16 %v1061_v32, %v1060_v63  ;;  %v1342_v35 = vld [vmem:[%s2047_s4 + $0x6] ss:$0 sm:$0xff] }
 0x501   :  { %v1708_v16 = vpop.eup %1707 }
 0x502   :  { %v573_v8 = vmul.f32 %v1708_v16, %v1960_v39  ;;  %v1055_v39 = vld [vmem:[#allocation4 + $0x68] sm:$0xff]  ;;  %v1339_v16 = vld [vmem:[%s2047_s4 + $0x5] ss:$0 sm:$0xff] }
 0x503   :  { %v1633_v41 = vpack.c.bf16 %v1055_v39, %v1054_v38 }
 0x506   :  { %1490 = vmatmul.mubr.msk.f32.vlgmr.msra.gmra.mrb[8].mxu1 %vm485_vm1, %v567_v1  ;;  %v1336_v1 = vld [vmem:[%s2047_s4 + $0x4] ss:$0 sm:$0xff] }
 0x507   :  { %1610 = vmatpush3.bf16.msk.msra.mxu1 %vm1606_vm6, %v1593_v56  ;;  %1496 = vmatprep.mubr.msk.f32.mxu1 %vm485_vm1, %v570_v3 }
 0x508   :  { %1613 = vmatprep.subr.msk.bf16.mxu1 %vm1612_vm3, %v1593_v56 }
 0x50e   :  { %1497 = vmatmul.mubr.msk.f32.vlgmr.msra.gmra.mrb[8].mxu1 %vm485_vm1, %v571_v6 }
 0x50f   :  { %1616 = vmatpush3.bf16.msk.msra.mxu1 %vm1612_vm3, %v1593_v56  ;;  %1503 = vmatprep.mubr.msk.f32.mxu1 %vm485_vm1, %v572_v7 }
 0x510   :  { %1634 = vmatprep.subr.bf16.mxu1 %v1633_v41 }
 0x516   :  { %1504 = vmatmul.mubr.msk.f32.vlgmr.msra.gmra.mrb[8].mxu1 %vm485_vm1, %v573_v8 }
 0x517   :  { %1636 = vmatpush3.bf16.msra.mxu1 %v1633_v41 }
 0x518   :  { %1638 = vmatprep.subr.bf16.mxu1 %v1637_v43 }
 0x51b   :  { %1640 = vmatpush3.bf16.msra.mxu1 %v1637_v43 }
 0x51c   :  { %1642 = vmatprep.subr.bf16.mxu1 %v1641_v46 }
 0x51f   :  { %1644 = vmatpush3.bf16.msra.mxu1 %v1641_v46 }
 0x520   :  { %1646 = vmatprep.subr.bf16.mxu1 %v1645_v0 }
 0x523   :  { %1648 = vmatpush3.bf16.msra.mxu1 %v1645_v0 }
 0x5e9   :  { %v1505_v9 = vpop.f32.mrb[8].mxu1 }
 0x5ea   :  { %v905_v11 = vpop.f32.mrb[9].mxu1 }
 0x5eb   :  { %1514 = vmatprep.mubr.msk.f32.mxu0 %vm188_vm2, %v905_v11 }
 0x5ec   :  { %1515 = vmatmul.mubr.msk.f32.vlgmr.msra.gmra.mrb[4].mxu0 %vm188_vm2, %v1505_v9 }
 0x6bf   :  { %v1516_v14 = vpop.f32.mrb[4].mxu0 }
 0x6c0   :  { %v997_v15 = vpop.f32.mrb[5].mxu0  ;;  %v1003_v17 = vadd.f32 %v1516_v14, %v1331_v12 }
 0x6c1   :  { %v998_v18 = vadd.f32 %v1331_v12, %v997_v15 }
 0x6c2   :  { %v1007_v21 = vadd.f32 %v1003_v17, %v1867_v62  ;;  %v1050_v62 = vld [vmem:[#allocation4 + $0x48] sm:$0xff] }
 0x6c3   :  { %v1006_v19 = vadd.f32 %v998_v18, %v1865_v61  ;;  %v1625_v34 = vpack.c.bf16 %v1050_v62, %v1049_v33 }
 0x6c4   :  { %v1013_v22 = vsel %vm188_vm2, %v1007_v21, 0.0 }
 0x6c5   :  { %v1010_v20 = vsel %vm188_vm2, %v1006_v19, 0.0  ;;  %1626 = vmatprep.subr.bf16.mxu0 %v1625_v34 }
 0x6c6   :  { %1011 = vadd.xlane.f32.xlu1 %v1010_v20  ;;  %1628 = vmatpush3.bf16.msra.mxu0 %v1625_v34 }
 0x6c7   :  { %1630 = vmatprep.subr.bf16.mxu0 %v1629_v37 }
 0x6ca   :  { %1014 = vadd.xlane.f32.xlu1 %v1013_v22  ;;  %1632 = vmatpush3.bf16.msra.mxu0 %v1629_v37  ;;  %v1343_v37 = vld [vmem:[%s2047_s4 + $0x7] ss:$0 sm:$0xff] }
 0x753   :  { %v1012_v23 = vpop.xlane.xlu1 %1011 }
 0x754   :  { %v1017_v24 = vmul.f32 0.03125, %v1012_v23 }
 0x756   :  { %v1019_v25 = vsub.f32 %v1006_v19, %v1017_v24 }
 0x757   :  { %v1015_v26 = vpop.xlane.xlu1 %1014 }
 0x758   :  { %v1018_v27 = vmul.f32 0.03125, %v1015_v26  ;;  %v1021_v28 = vmul.f32 %v1019_v25, %v1019_v25 }
 0x75a   :  { %v1020_v29 = vsub.f32 %v1007_v21, %v1018_v27  ;;  %v1023_v30 = vsel %vm188_vm2, %v1021_v28, 0.0 }
 0x75b   :  { %1024 = vadd.xlane.f32.xlu1 %v1023_v30 }
 0x75c   :  { %v1022_v31 = vmul.f32 %v1020_v29, %v1020_v29 }
 0x75e   :  { %v1026_v61 = vsel %vm188_vm2, %v1022_v31, 0.0 }
 0x75f   :  { %1027 = vadd.xlane.f32.xlu1 %v1026_v61 }
 0x7e8   :  { %v1025_v47 = vpop.xlane.xlu1 %1024 }
 0x7e9   :  { %v1029_v48 = vmul.f32 0.03125, %v1025_v47 }
 0x7eb   :  { %v1031_v49 = vadd.f32 1e-05, %v1029_v48 }
 0x7ec   :  { %v1028_v50 = vpop.xlane.xlu1 %1027 }
 0x7ed   :  { %1709 = vrsqrt.f32 %v1031_v49  ;;  %v1030_v51 = vmul.f32 0.03125, %v1028_v50 }
 0x7ef   :  { %v1032_v52 = vadd.f32 1e-05, %v1030_v51 }
 0x7f1   :  { %1711 = vrsqrt.f32 %v1032_v52 }
 0x7f7   :  { %v1710_v5 = vpop.eup %1709 }
 0x7f8   :  { %v1035_v54 = vmul.f32 %v1710_v5, %v1019_v25 }
 0x7fa   :  { %v1041_v56 = vmul.f32 %v1334_v53, %v1035_v54 }
 0x7fb   :  { %v1712_v57 = vpop.eup %1711 }
 0x7fc   :  { %v1036_v58 = vmul.f32 %v1712_v57, %v1020_v29  ;;  %v1047_v59 = vadd.f32 %v1335_v55, %v1041_v56 }
 0x7fe   :  { %v1042_v60 = vmul.f32 %v1334_v53, %v1036_v58  ;;  %1525 = vmatprep.mubr.msk.f32.mxu0 %vm188_vm2, %v1047_v59 }
 0x800   :  { %v1048_v10 = vadd.f32 %v1335_v55, %v1042_v60 }
 0x802   :  { %1526 = vmatmul.mubr.msk.f32.vlgmr.msra.gmra.mrb[6].mxu0 %vm188_vm2, %v1048_v10 }
 0x8d5   :  { %v1527_v2 = vpop.f32.mrb[6].mxu0 }
 0x8d6   :  { %v1145_v3 = vadd.f32 %v1527_v2, %v1336_v1  ;;  %v1139_v13 = vpop.f32.mrb[7].mxu0 }
 0x8d7   :  { %v1140_v4 = vadd.f32 %v1336_v1, %v1139_v13 }
 0x8d8   :  { %v1149_v7 = vmax.f32 %v1145_v3, 0.0 }
 0x8d9   :  { %v1148_v6 = vmax.f32 %v1140_v4, 0.0 }
 0x8db   :  { %1544 = vmatprep.mubr.msk.f32.mxu1 %vm1154_vm7, %v1148_v6 }
 0x8dc   :  { %1545 = vmatmul.mubr.msk.f32.vlgmr.msra.gmra.mrb[10].mxu1 %vm1154_vm7, %v1149_v7 }
 0x9af   :  { %v1546_v8 = vpop.f32.mrb[10].mxu1 }
 0x9b0   :  { %v1233_v9 = vadd.f32 %v1546_v8, %v1339_v16  ;;  %v1227_v11 = vpop.f32.mrb[11].mxu1 }
 0x9b1   :  { %v1228_v12 = vadd.f32 %v1339_v16, %v1227_v11 }
 0x9b2   :  { %v1237_v14 = vadd.f32 %v1233_v9, %v1048_v10 }
 0x9b3   :  { %v1236_v15 = vadd.f32 %v1228_v12, %v1047_v59 }
 0x9b4   :  { %v1243_v17 = vsel %vm188_vm2, %v1237_v14, 0.0 }
 0x9b5   :  { %1244 = vadd.xlane.f32.xlu1 %v1243_v17  ;;  %v1240_v18 = vsel %vm188_vm2, %v1236_v15, 0.0 }
 0x9b6   :  { %1241 = vadd.xlane.f32.xlu0 %v1240_v18 }
 0xa42   :  { %v1245_v19 = vpop.xlane.xlu1 %1244 }
 0xa43   :  { %v1247_v20 = vmul.f32 0.03125, %v1245_v19  ;;  %v1242_v21 = vpop.xlane.xlu0 %1241 }
 0xa44   :  { %v1246_v22 = vmul.f32 0.03125, %v1242_v21 }
 0xa45   :  { %v1249_v23 = vsub.f32 %v1237_v14, %v1247_v20 }
 0xa46   :  { %v1248_v24 = vsub.f32 %v1236_v15, %v1246_v22 }
 0xa47   :  { %v1251_v27 = vmul.f32 %v1249_v23, %v1249_v23 }
 0xa48   :  { %v1250_v25 = vmul.f32 %v1248_v24, %v1248_v24 }
 0xa49   :  { %v1255_v28 = vsel %vm188_vm2, %v1251_v27, 0.0 }
 0xa4a   :  { %v1252_v26 = vsel %vm188_vm2, %v1250_v25, 0.0 }
 0xa4b   :  { %1253 = vadd.xlane.f32.xlu1 %v1252_v26 }
 0xa4f   :  { %1256 = vadd.xlane.f32.xlu1 %v1255_v28 }
 0xad8   :  { %v1254_v29 = vpop.xlane.xlu1 %1253 }
 0xad9   :  { %v1258_v30 = vmul.f32 0.03125, %v1254_v29 }
 0xadb   :  { %v1260_v31 = vadd.f32 1e-05, %v1258_v30 }
 0xadc   :  { %v1257_v61 = vpop.xlane.xlu1 %1256 }
 0xadd   :  { %1713 = vrsqrt.f32 %v1260_v31  ;;  %v1259_v33 = vmul.f32 0.03125, %v1257_v61 }
 0xadf   :  { %v1261_v62 = vadd.f32 1e-05, %v1259_v33 }
 0xae1   :  { %1715 = vrsqrt.f32 %v1261_v62 }
 0xae7   :  { %v1714_v34 = vpop.eup %1713 }
 0xae8   :  { %v1264_v36 = vmul.f32 %v1714_v34, %v1248_v24 }
 0xaea   :  { %v1270_v38 = vmul.f32 %v1342_v35, %v1264_v36 }
 0xaeb   :  { %v1716_v39 = vpop.eup %1715 }
 0xaec   :  { %v1265_v40 = vmul.f32 %v1716_v39, %v1249_v23  ;;  %v1276_v41 = vadd.f32 %v1343_v37, %v1270_v38 }
 0xaee   :  { %v1271_v42 = vmul.f32 %v1342_v35, %v1265_v40  ;;  %1278 = vst.msk [vmem:[#allocation7] sm:$0xff] %vm188_vm2, %v1276_v41 }
 0xaf0   :  { %v1277_v43 = vadd.f32 %v1343_v37, %v1271_v42 }
 0xaf2   :  { %1279 = vst.msk [vmem:[#allocation7 + $0x8] sm:$0xff] %vm188_vm2, %v1277_v43 }
 0xaf3   :  { %1762 = shalt.err (!%p1759_p3)
}
 0xaf4   :  { %s1763_s22 = scalar_lea.hbm %s2048_s5, 256 }
 0xaf5   :  { %p1764_p4 = scmp.ne.s32.totalorder %s2048_s5, %s1763_s22  ;;  %p1767_p5 = scmp.lt.u32.totalorder %s1763_s22, %s2048_s5 }
 0xaf7   :  { %p1769_p6 = pnand %p1767_p5, %p1764_p4 }
 0xaf9   :  { %1772 = shalt.err (!%p1769_p6)
}
 0xafa   :  { %1291 = dma.vmem_to_hbm [thread:$0]  %s1286_s19, 256, %s2048_s5, [#allocation6], %s1781_s7, %s1781_s7, %s1782_s8  }
 0xafb   :  { %1777 = dma.done.wait [#allocation6], 256  }
 0xafc   :  { %1778 = vsyncadd [#allocation6], 4294967040 }
 0xafd   :  { %1295 = vsyncpa [#allocation5], 1 }
 0xafe   :  { %1296 = vsyncpa [#allocation6], 1 }

</bundles_post_ra>
